<compile_context>
chip_gen: v7x
topology: tpu7x:2x2x1
jax: 0.10.0
libtpu: 0.0.40
codegen_flags: <defaults>
</compile_context>

<pallas_src>
import math

import jax
import jax.numpy as jnp
from jax.experimental import pallas as pl
from jax.experimental.pallas import tpu as pltpu


def _copy_kernel(x_ref, o_ref):
    # Pure identity copy over identically shaped lane-dense blocks.
    o_ref[...] = x_ref[...]


def _lane_dense_2d(numel: int):
    """Pick a lane-dense (M, L) factorization of numel (L a multiple of 128).

    Returns (m, lane, pad) where m * lane == numel + pad and pad < 128.
    """
    for lane in (1024, 512, 256, 128):
        if numel % lane == 0:
            return numel // lane, lane, 0
    # Not a multiple of 128: pad up to the next multiple of 128 and slice in
    # the wrapper.  Never emit a single full-array block.
    lane = 128
    padded = ((numel + lane - 1) // lane) * lane
    return padded // lane, lane, padded - numel


def _pick_tm(m: int, lane: int, itemsize: int) -> int:
    """Dtype-aware row-tile: ~4 MiB/tile, sublane-aligned, prefer tm | m."""
    sublane = max(8, 32 // itemsize)          # 8 f32 / 16 bf16 / 32 int8
    target_bytes = 4 * 1024 * 1024            # <= 16 MiB double-buffered (v7x safe)
    tm_cap = max(sublane, (target_bytes // (lane * itemsize)) // sublane * sublane)
    if m <= tm_cap:
        return m                              # full-axis block is always legal
    # Prefer a tm that divides m so the last grid step is not a padded tile.
    for tm in range(tm_cap, sublane - 1, -sublane):
        if m % tm == 0:
            return tm
    return tm_cap                              # ragged last tile (correct, rare)


def _pallas_copy_2d(x2d: jax.Array) -> jax.Array:
    """Tiled lane-dense memcpy of a 2D array through a Pallas kernel."""
    m, lane = x2d.shape
    itemsize = jnp.dtype(x2d.dtype).itemsize
    tm = _pick_tm(m, lane, itemsize)
    grid = (pl.cdiv(m, tm),)

    return pl.pallas_call(
        _copy_kernel,
        out_shape=jax.ShapeDtypeStruct((m, lane), x2d.dtype),
        grid_spec=pltpu.PrefetchScalarGridSpec(
            num_scalar_prefetch=0,
            grid=grid,
            in_specs=[pl.BlockSpec((tm, lane), lambda i: (i, 0))],
            out_specs=pl.BlockSpec((tm, lane), lambda i: (i, 0)),
        ),
        compiler_params=pltpu.CompilerParams(
            dimension_semantics=("parallel",),
            vmem_limit_bytes=32 * 1024 * 1024,
        ),
        cost_estimate=pl.CostEstimate(
            flops=0,
            transcendentals=0,
            bytes_accessed=2 * m * lane * itemsize,
        ),
    )(x2d)


def unsqueeze(x: jax.Array, dim: int, *, use_pallas_copy: bool = False) -> jax.Array:
    """Equivalent of torch.Tensor.unsqueeze(dim).

    Default: free metadata reshape (recommended).  Set use_pallas_copy=True to
    force an explicit tiled memcpy through a Pallas kernel.
    """
    ndim = x.ndim
    # PyTorch allows dim in [-(ndim+1), ndim].
    d = dim if dim >= 0 else dim + ndim + 1
    assert 0 <= d <= ndim, f"invalid unsqueeze dim {dim} for rank {ndim}"

    out_shape = x.shape[:d] + (1,) + x.shape[d:]

    if not use_pallas_copy or x.size == 0:
        # Zero-byte metadata reshape.
        return jnp.reshape(x, out_shape)

    numel = x.size
    m, lane, pad = _lane_dense_2d(numel)

    xf = jnp.reshape(x, (numel,))             # free (row-major, contiguous)
    if pad:
        xf = jnp.pad(xf, (0, pad))            # only when numel % 128 != 0
    x2d = jnp.reshape(xf, (m, lane))
    y2d = _pallas_copy_2d(x2d)                # Pallas tiled identity memcpy
    yf = jnp.reshape(y2d, (m * lane,))
    if pad:
        yf = yf[:numel]
    return jnp.reshape(yf, out_shape)         # free


if __name__ == "__main__":
    key = jax.random.PRNGKey(0)
    # Small NCHW-like input, matching the module's typical use.
    x = jax.random.normal(key, (2, 4, 16, 16), dtype=jnp.float32)

    dim = 1  # Unsqueeze(dim=1)
    ref = jnp.expand_dims(x, dim)

    # Default (free reshape) path.
    y_fast = unsqueeze(x, dim)
    y_fast = jax.block_until_ready(y_fast)
    assert y_fast.shape == (2, 1, 4, 16, 16), y_fast.shape
    assert y_fast.dtype == x.dtype
    assert jnp.array_equal(y_fast, ref), "reshape path mismatch"

    # Explicit Pallas copy path (lane-dense tiled memcpy, numel % 128 == 0).
    y_copy = unsqueeze(x, dim, use_pallas_copy=True)
    y_copy = jax.block_until_ready(y_copy)
    assert y_copy.shape == (2, 1, 4, 16, 16), y_copy.shape
    assert y_copy.dtype == x.dtype
    assert jnp.array_equal(y_copy, ref), "pallas copy path mismatch"

    # Negative dim, as PyTorch allows it.
    y_neg = unsqueeze(x, -1, use_pallas_copy=True)
    y_neg = jax.block_until_ready(y_neg)
    assert jnp.array_equal(y_neg, jnp.expand_dims(x, -1)), "negative-dim mismatch"

    # Odd element count (numel % 128 != 0) exercises the padded Pallas path.
    x_odd = jax.random.normal(jax.random.PRNGKey(1), (3, 5, 7), dtype=jnp.float32)
    y_odd = unsqueeze(x_odd, 0, use_pallas_copy=True)
    y_odd = jax.block_until_ready(y_odd)
    assert y_odd.shape == (1, 3, 5, 7), y_odd.shape
    assert jnp.array_equal(y_odd, jnp.expand_dims(x_odd, 0)), "padded path mismatch"

    # bf16 exercises the dtype-aware tile selection (sublane packing = 16).
    x_bf = jax.random.normal(jax.random.PRNGKey(2), (2, 4, 16, 16)).astype(jnp.bfloat16)
    y_bf = unsqueeze(x_bf, 2, use_pallas_copy=True)
    y_bf = jax.block_until_ready(y_bf)
    assert y_bf.shape == (2, 4, 1, 16, 16), y_bf.shape
    assert jnp.array_equal(y_bf, jnp.expand_dims(x_bf, 2)), "bf16 path mismatch"

    print("KERNEL_OK")
</pallas_src>

<mosaic_0001>
module attributes {stable_mosaic.version = 11 : i64} {
  func.func @_copy_kernel(%arg0: i32, %arg1: memref<2x1024xf32, #tpu.memory_space<vmem>>, %arg2: memref<2x1024xf32, #tpu.memory_space<vmem>>) attributes {dimension_semantics = [#tpu.dimension_semantics<parallel>], iteration_bounds = array<i64: 1>, scalar_prefetch = 0 : i64, scratch_operands = 0 : i64, tpu.core_type = #tpu.core_type<tc>, window_params = [{transform_indices = @transform_0, window_bounds = array<i64: 2, 1024>}, {transform_indices = @transform_1, window_bounds = array<i64: 2, 1024>}]} {
    %c0 = arith.constant 0 : index
    %c0_0 = arith.constant 0 : index
    %0 = vector.load %arg1[%c0, %c0_0] : memref<2x1024xf32, #tpu.memory_space<vmem>>, vector<2x1024xf32>
    %c0_1 = arith.constant 0 : index
    %c0_2 = arith.constant 0 : index
    %1 = vector.load %arg2[%c0_1, %c0_2] : memref<2x1024xf32, #tpu.memory_space<vmem>>, vector<2x1024xf32>
    tpu.vector_store %arg2[%c0_1, %c0_2], %0 {strides = array<i32>} : memref<2x1024xf32, #tpu.memory_space<vmem>>, vector<2x1024xf32>,
    return
  }
  func.func @transform_0(%arg0: i32) -> (i32, i32) {
    %c0_i32 = arith.constant 0 : i32
    %c0_i32_0 = arith.constant 0 : i32
    return %arg0, %c0_i32 : i32, i32
  }
  func.func @transform_1(%arg0: i32) -> (i32, i32) {
    %c0_i32 = arith.constant 0 : i32
    %c0_i32_0 = arith.constant 0 : i32
    return %arg0, %c0_i32 : i32, i32
  }
}

</mosaic_0001>

<bundles_post_ra>
// kernel: tpu_custom_call.1
= control target key start
LH: loop header
LB: loop body
LE: loop exit
PB: predicated region body
PF: predicated region fallthrough
CT: control target
= control target key end

     0   :  { %6 = vsyncpa [#allocation3], 0  ;;  %s126_s0 = inlined_call_operand.hbm [shape: f32[2,1024], index: 0, kind: input, shape index: {}]   ;;  %s127_s1 = inlined_call_operand.hbm [shape: f32[2,1024], index: 1, kind: output, shape index: {}]  }
   0x1   :  { %7 = vsyncpa [#allocation4], 0  ;;  %s90_s6 = smov [#allocation2]   ;;  %s42_s10 = scalar_lea.hbm %s126_s0, 256 }
   0x2   :  { %s14_s7 = sshll.u32 %s90_s6, 4  ;;  %p43_p0 = scmp.ne.s32.totalorder %s126_s0, %s42_s10  ;;  %s15_s7 = int_to_ptr.vmem [resolvable:$true] %s14_s7 }
   0x3   :  { %p46_p1 = scmp.lt.u32.totalorder %s42_s10, %s126_s0 }
   0x5   :  { %p48_p2 = pnand %p46_p1, %p43_p0 }
   0x7   :  { %51 = shalt.err (!%p48_p2)
}
   0x8   :  { %s52_s15 = scalar_lea.vmem %s15_s7, 256  ;;  %p57_p4 = scmp.lt.s32.totalorder %s15_s7, %s15_s7 }
   0x9   :  { %p53_p3 = scmp.ne.s32.totalorder %s15_s7, %s52_s15  ;;  %p58_p5 = scmp.lt.s32.totalorder %s52_s15, %s52_s15 }
   0xb   :  { %p59_p6 = por %p58_p5, %p57_p4 }
   0xd   :  { %p60_p7 = pnand %p59_p6, %p53_p3 }
   0xf   :  { %63 = shalt.err (!%p60_p7)
}
  0x10   :  { %17 = dma.hbm_to_vmem [thread:$0]  %s126_s0, 256, %s15_s7, [#allocation3]  }
  0x11   :  { %86 = dma.done.wait [#allocation3], 256  }
  0x12   :  { %87 = vsyncadd [#allocation3], 4294967040  ;;  %s91_s18 = smov [#allocation5]   ;;  %v21_v0 = vld [vmem:[#allocation2] sm:$0xff]  ;;  %v22_v1 = vld [vmem:[#allocation2 + $0x8] sm:$0xff] }
  0x13   :  { %s31_s19 = sshll.u32 %s91_s18, 4  ;;  %23 = vst [vmem:[#allocation5] sm:$0xff] %v21_v0  ;;  %24 = vst [vmem:[#allocation5 + $0x8] sm:$0xff] %v22_v1  ;;  %s32_s19 = int_to_ptr.vmem [resolvable:$true] %s31_s19 }
  0x14   :  { %s64_s20 = scalar_lea.vmem %s32_s19, 256  ;;  %p69_p9 = scmp.lt.s32.totalorder %s32_s19, %s32_s19 }
  0x15   :  { %p65_p8 = scmp.ne.s32.totalorder %s32_s19, %s64_s20  ;;  %p70_p10 = scmp.lt.s32.totalorder %s64_s20, %s64_s20 }
  0x17   :  { %p71_p11 = por %p70_p10, %p69_p9 }
  0x19   :  { %p72_p12 = pnand %p71_p11, %p65_p8 }
  0x1b   :  { %75 = shalt.err (!%p72_p12)
}
  0x1c   :  { %s76_s0 = scalar_lea.hbm %s127_s1, 256 }
  0x1d   :  { %p77_p13 = scmp.ne.s32.totalorder %s127_s1, %s76_s0  ;;  %p80_p0 = scmp.lt.u32.totalorder %s76_s0, %s127_s1 }
  0x1f   :  { %p82_p1 = pnand %p80_p0, %p77_p13 }
  0x21   :  { %85 = shalt.err (!%p82_p1)
}
  0x22   :  { %34 = dma.vmem_to_hbm [thread:$0]  %s32_s19, 256, %s127_s1, [#allocation4]  }
  0x23   :  { %88 = dma.done.wait [#allocation4], 256  }
  0x24   :  { %89 = vsyncadd [#allocation4], 4294967040 }
  0x25   :  { %38 = vsyncpa [#allocation3], 1 }
  0x26   :  { %39 = vsyncpa [#allocation4], 1 }

</bundles_post_ra>
